<compile_context>
chip_gen: v7x
topology: tpu7x:2x2x1
jax: 0.10.0
libtpu: 0.0.40
codegen_flags: <defaults>
</compile_context>

<pallas_src>
import functools

import jax
import jax.numpy as jnp
from jax.experimental import pallas as pl
from jax.experimental.pallas import tpu as pltpu


# ----------------------------------------------------------------------------
# One-time parameter preparation (NOT in the forward hot path):
# fold Conv1d / ConvTranspose1d (padding, stride, output_padding, im2col)
# into dense matrices acting on the C-major / L-minor flat layout.
# ----------------------------------------------------------------------------
def conv1d_as_matrix(w, lin, stride, padding):
    """PyTorch Conv1d weight (Cout, Cin, K) -> dense (Cin*Lin, Cout*Lout)."""
    w = jnp.asarray(w, jnp.float32)
    cout, cin, k = w.shape
    lout = (lin + 2 * padding - k) // stride + 1
    lo = jnp.arange(lout)
    kk = jnp.arange(k)
    li = lo[:, None] * stride + kk[None, :] - padding            # (Lout, K)
    valid = (li >= 0) & (li < lin)
    sel = ((jnp.arange(lin)[None, None, :] == li[:, :, None]) &
           valid[:, :, None]).astype(jnp.float32)                # (Lout, K, Lin)
    m = jnp.einsum("lkt,ock->ctol", sel, w)                      # (Cin, Lin, Cout, Lout)
    return m.reshape(cin * lin, cout * lout)


def conv_transpose1d_as_matrix(w, lin, stride, padding, output_padding):
    """PyTorch ConvTranspose1d weight (Cin, Cout, K) -> dense (Cin*Lin, Cout*Lout)."""
    w = jnp.asarray(w, jnp.float32)
    cin, cout, k = w.shape
    lout = (lin - 1) * stride - 2 * padding + k + output_padding
    li = jnp.arange(lin)
    kk = jnp.arange(k)
    lo = li[:, None] * stride + kk[None, :] - padding            # (Lin, K)
    valid = (lo >= 0) & (lo < lout)
    sel = ((jnp.arange(lout)[None, None, :] == lo[:, :, None]) &
           valid[:, :, None]).astype(jnp.float32)                # (Lin, K, Lout)
    m = jnp.einsum("tkl,cok->ctol", sel, w)                      # (Cin, Lin, Cout, Lout)
    return m.reshape(cin * lin, cout * lout)


def conv_bias_flat(b, lout):
    """bias (Cout,) -> (1, Cout*Lout) in channel-major flat layout."""
    return jnp.repeat(jnp.asarray(b, jnp.float32), lout).reshape(1, -1)


# ----------------------------------------------------------------------------
# Config / layout of the packed slabs (all static Python, built from cfg).
# ----------------------------------------------------------------------------
def make_config():
    cfg = dict(
        input_dim=16, hidden_dim=32, z_dim=8,
        num_embeddings=32, embedding_dim=8, commitment_cost=0.25,
        enc_conv_channels=[4, 8, 8], dec_conv_channels=[8, 4, 4],
        kernel_size=3, stride_enc2=2, stride_dec2=2,
    )
    p = (cfg["kernel_size"] - 1) // 2
    L1 = cfg["input_dim"]
    L2 = (L1 + 2 * p - cfg["kernel_size"]) // cfg["stride_enc2"] + 1
    L3 = (L2 + 2 * p - cfg["kernel_size"]) // 1 + 1
    cfg["padding"] = p
    cfg["L1"], cfg["L2"], cfg["L3"] = L1, L2, L3
    cfg["conv_out_length"] = L3
    cfg["flat_dim"] = cfg["enc_conv_channels"][-1] * L3
    return cfg


def build_layout(cfg):
    """Static row/col layout of the packed weight slab (bf16) and misc slab (f32)."""
    c1, c2, c3 = cfg["enc_conv_channels"]
    d1, d2, d3 = cfg["dec_conv_channels"]
    L1, L2, L3 = cfg["L1"], cfg["L2"], cfg["L3"]
    hid, zd, N = cfg["hidden_dim"], cfg["z_dim"], cfg["num_embeddings"]
    flat = cfg["flat_dim"]

    def rup(n, m):
        return -(-n // m) * m

    # (name, rows = fan-in, cols = fan-out) in hot-path order.
    w_entries = [
        ("ew1", 1 * L1, c1 * L1),
        ("ew2", c1 * L1, c2 * L2),
        ("ew3", c2 * L2, c3 * L3),
        ("fcw", flat, hid),
        ("zw", hid, zd),
        ("dfw", zd, flat),
        ("dw1", c3 * L3, d1 * L3),
        ("dw2", d1 * L3, d2 * L1),
        ("dw3", d2 * L1, d3 * L1),
        ("dwf", d3 * L1, 1 * L1),
    ]
    w_layout, row = {}, 0
    for name, nr, nc in w_entries:
        assert nc <= 128, name
        w_layout[name] = (row, nr, nc)
        row += rup(nr, 16)            # bf16 sublane-tile (16) aligned row starts
    w_rows = rup(row, 16)

    b_entries = [
        ("eb1", c1 * L1), ("eb2", c2 * L2), ("eb3", c3 * L3), ("fcb", hid),
        ("zb", zd), ("dfb", flat), ("db1", d1 * L3), ("db2", d2 * L1),
        ("db3", d3 * L1), ("dbf", 1 * L1), ("emb2", N),
    ]
    b_layout = {name: (i, nc) for i, (name, nc) in enumerate(b_entries)}
    embt_row = rup(len(b_entries), 8)          # pre-transposed codebook (D, N)
    emb_row = embt_row + rup(zd, 8)            # codebook (N, D)
    m_rows = emb_row + rup(N, 8)

    mm_terms = sum(nr * nc for _, nr, nc in w_entries) + 2 * zd * N
    return dict(w=w_layout, w_rows=w_rows, b=b_layout,
                embt_row=embt_row, emb_row=emb_row, m_rows=m_rows,
                mm_terms=mm_terms)


# ----------------------------------------------------------------------------
# Deterministic parameter init + one-time slab packing.
# ----------------------------------------------------------------------------
def _uniform(key, shape, scale):
    return jax.random.uniform(key, shape, jnp.float32, -scale, scale)


def init_params(key, cfg):
    K = cfg["kernel_size"]
    c1, c2, c3 = cfg["enc_conv_channels"]
    d1, d2, d3 = cfg["dec_conv_channels"]
    keys = jax.random.split(key, 24)
    ki = iter(keys)

    def conv_init(cin, cout, k):
        s = 1.0 / (cin * k) ** 0.5
        return _uniform(next(ki), (cout, cin, k), s), _uniform(next(ki), (cout,), s)

    def deconv_init(cin, cout, k):
        s = 1.0 / (cin * k) ** 0.5
        return _uniform(next(ki), (cin, cout, k), s), _uniform(next(ki), (cout,), s)

    def linear_init(fin, fout):
        s = 1.0 / fin ** 0.5
        return _uniform(next(ki), (fin, fout), s), _uniform(next(ki), (fout,), s)

    p = {}
    p["enc_conv1_w"], p["enc_conv1_b"] = conv_init(1, c1, K)
    p["enc_conv2_w"], p["enc_conv2_b"] = conv_init(c1, c2, K)
    p["enc_conv3_w"], p["enc_conv3_b"] = conv_init(c2, c3, K)
    p["enc_fc_w"], p["enc_fc_b"] = linear_init(cfg["flat_dim"], cfg["hidden_dim"])
    p["fc_z_w"], p["fc_z_b"] = linear_init(cfg["hidden_dim"], cfg["z_dim"])
    p["embedding"] = _uniform(next(ki), (cfg["num_embeddings"], cfg["embedding_dim"]),
                              1.0 / cfg["num_embeddings"])
    p["dec_fc_w"], p["dec_fc_b"] = linear_init(cfg["z_dim"], cfg["flat_dim"])
    p["dec_deconv1_w"], p["dec_deconv1_b"] = deconv_init(c3, d1, K)
    p["dec_deconv2_w"], p["dec_deconv2_b"] = deconv_init(d1, d2, K)
    p["dec_deconv3_w"], p["dec_deconv3_b"] = deconv_init(d2, d3, K)
    p["dec_final_w"], p["dec_final_b"] = deconv_init(d3, 1, 1)
    return p


def prepare_params(params, cfg):
    """One-time: fold convs into dense maps and pack everything into 2 slabs."""
    lay = build_layout(cfg)
    p_pad = cfg["padding"]
    L1, L2, L3 = cfg["L1"], cfg["L2"], cfg["L3"]
    s_e, s_d = cfg["stride_enc2"], cfg["stride_dec2"]

    folded = {
        "ew1": conv1d_as_matrix(params["enc_conv1_w"], L1, 1, p_pad),
        "ew2": conv1d_as_matrix(params["enc_conv2_w"], L1, s_e, p_pad),
        "ew3": conv1d_as_matrix(params["enc_conv3_w"], L2, 1, p_pad),
        "fcw": jnp.asarray(params["enc_fc_w"], jnp.float32),
        "zw": jnp.asarray(params["fc_z_w"], jnp.float32),
        "dfw": jnp.asarray(params["dec_fc_w"], jnp.float32),
        "dw1": conv_transpose1d_as_matrix(params["dec_deconv1_w"], L3, 1, p_pad, 0),
        # output_padding = stride_dec2 - 1, exactly as in the PyTorch module.
        "dw2": conv_transpose1d_as_matrix(params["dec_deconv2_w"], L3, s_d, p_pad, s_d - 1),
        "dw3": conv_transpose1d_as_matrix(params["dec_deconv3_w"], L1, 1, p_pad, 0),
        "dwf": conv_transpose1d_as_matrix(params["dec_final_w"], L1, 1, 0, 0),
    }
    biases = {
        "eb1": conv_bias_flat(params["enc_conv1_b"], L1),
        "eb2": conv_bias_flat(params["enc_conv2_b"], L2),
        "eb3": conv_bias_flat(params["enc_conv3_b"], L3),
        "fcb": jnp.asarray(params["enc_fc_b"], jnp.float32).reshape(1, -1),
        "zb": jnp.asarray(params["fc_z_b"], jnp.float32).reshape(1, -1),
        "dfb": jnp.asarray(params["dec_fc_b"], jnp.float32).reshape(1, -1),
        "db1": conv_bias_flat(params["dec_deconv1_b"], L3),
        "db2": conv_bias_flat(params["dec_deconv2_b"], L1),
        "db3": conv_bias_flat(params["dec_deconv3_b"], L1),
        "dbf": conv_bias_flat(params["dec_final_b"], L1),
    }
    emb = jnp.asarray(params["embedding"], jnp.float32)            # (N, D)
    biases["emb2"] = jnp.sum(emb * emb, axis=1).reshape(1, -1)     # (1, N)

    # Weight slab: bf16 (MXU-native), 128-lane dense, tile-aligned row spans.
    wslab = jnp.zeros((lay["w_rows"], 128), jnp.float32)
    for name, (r0, nr, nc) in lay["w"].items():
        mat = folded[name]
        assert mat.shape == (nr, nc), (name, mat.shape, (nr, nc))
        wslab = wslab.at[r0:r0 + nr, 0:nc].set(mat)
    wslab = wslab.astype(jnp.bfloat16)

    # Misc slab: f32 biases + ||e||^2 + codebook (and its pre-transposed copy).
    mslab = jnp.zeros((lay["m_rows"], 128), jnp.float32)
    for name, (r, nc) in lay["b"].items():
        vec = biases[name]
        assert vec.shape == (1, nc), (name, vec.shape, nc)
        mslab = mslab.at[r:r + 1, 0:nc].set(vec)
    D, N = cfg["z_dim"], cfg["num_embeddings"]
    mslab = mslab.at[lay["embt_row"]:lay["embt_row"] + D, 0:N].set(emb.T)
    mslab = mslab.at[lay["emb_row"]:lay["emb_row"] + N, 0:D].set(emb)

    return {"wslab": wslab, "mslab": mslab}


# ----------------------------------------------------------------------------
# The fused Pallas kernel: whole forward per batch tile, intermediates in VMEM.
# ----------------------------------------------------------------------------
def _fused_kernel(x_ref, w_ref, m_ref, recon_ref, loss_ref, *,
                  lay, batch, tile_b, num_embeddings, z_dim):
    wl, bl = lay["w"], lay["b"]

    def w(name):
        r0, nr, nc = wl[name]
        return w_ref[r0:r0 + nr, 0:nc]          # static, tile-aligned slice (bf16)

    def b(name):
        r, nc = bl[name]
        return m_ref[r:r + 1, 0:nc]             # (1, nc) f32 bias row

    def dense(h, wn, bn, relu):
        y = jnp.dot(h.astype(jnp.bfloat16), w(wn),
                    preferred_element_type=jnp.float32) + b(bn)
        return jnp.maximum(y, 0.0) if relu else y

    # ---- encoder (conv stack folded to dense maps on C-major flat layout) ----
    h = x_ref[...].astype(jnp.float32)
    h = dense(h, "ew1", "eb1", True)
    h = dense(h, "ew2", "eb2", True)
    h = dense(h, "ew3", "eb3", True)
    h = dense(h, "fcw", "fcb", True)            # flatten is a no-op in this layout
    z = dense(h, "zw", "zb", False)             # (tile_b, z_dim), f32 accumulated

    # ---- vector quantizer (f32 math; codebook pre-transposed at prep time) ----
    emb_t = m_ref[lay["embt_row"]:lay["embt_row"] + z_dim, 0:num_embeddings]  # (D, N)
    emb = m_ref[lay["emb_row"]:lay["emb_row"] + num_embeddings, 0:z_dim]      # (N, D)
    z2 = jnp.sum(z * z, axis=1, keepdims=True)                                # (b, 1)
    ze = jnp.dot(z, emb_t, preferred_element_type=jnp.float32)                # (b, N)
    d = z2 + b("emb2") - 2.0 * ze

    # torch.argmin tie-breaking: first minimal index.
    dmin = jnp.min(d, axis=1, keepdims=True)
    iota = jax.lax.broadcasted_iota(jnp.int32, d.shape, 1)
    idx = jnp.min(jnp.where(d <= dmin, iota, num_embeddings), axis=1, keepdims=True)
    onehot = (iota == idx).astype(jnp.float32)
    q = jnp.dot(onehot, emb, preferred_element_type=jnp.float32)              # (b, D)

    # Per-tile partial sum of squared (q - z), masked to real batch rows;
    # reduced to the mean-based loss in the wrapper.
    rows = pl.program_id(0) * tile_b + jax.lax.broadcasted_iota(
        jnp.int32, (tile_b, 1), 0)
    valid = (rows < batch).astype(jnp.float32)
    diff = q - z
    partial = jnp.sum(diff * diff * valid)
    loss_ref[...] = jnp.full(loss_ref.shape, partial, jnp.float32)            # lane-dense

    # ---- decoder (straight-through: forward value is q) ----
    y = dense(q, "dfw", "dfb", True)            # dec_fc; view(B, C, L) is a no-op
    y = dense(y, "dw1", "db1", True)
    y = dense(y, "dw2", "db2", True)
    y = dense(y, "dw3", "db3", True)
    recon_ref[...] = dense(y, "dwf", "dbf", False).astype(recon_ref.dtype)


# ----------------------------------------------------------------------------
# Forward wrapper: batch grid with resident weight slabs.
# ----------------------------------------------------------------------------
def conv_vqvae_forward(prep, x, cfg, tile_b=8):
    """x: (B, 1, input_dim) like the PyTorch module. Returns (recon, vq_loss)."""
    lay = build_layout(cfg)
    B = x.shape[0]
    L = cfg["input_dim"]
    D = cfg["z_dim"]
    N = cfg["num_embeddings"]

    # TODO(synk): for production batch sizes, bump tile_b to 128-512 (multiple
    # of 8) and present the recon output as a lane-dense (tiles, tile_b*L) slab.
    num_tiles = -(-B // tile_b)
    b_pad = num_tiles * tile_b

    x_flat = x.reshape(B, L).astype(jnp.float32)     # C-major flatten (Cin = 1)
    if b_pad != B:
        x_flat = jnp.pad(x_flat, ((0, b_pad - B), (0, 0)))

    wslab, mslab = prep["wslab"], prep["mslab"]

    kernel = functools.partial(
        _fused_kernel, lay=lay, batch=B, tile_b=tile_b,
        num_embeddings=N, z_dim=D)

    flops = 2 * b_pad * lay["mm_terms"]
    bytes_accessed = (wslab.size * 2 + mslab.size * 4 +
                      2 * b_pad * L * 4 + num_tiles * 8 * 128 * 4)

    recon_pad, loss_part = pl.pallas_call(
        kernel,
        grid=(num_tiles,),
        out_shape=(jax.ShapeDtypeStruct((b_pad, L), jnp.float32),
                   jax.ShapeDtypeStruct((num_tiles * 8, 128), jnp.float32)),
        in_specs=[
            pl.BlockSpec((tile_b, L), lambda i: (i, 0)),
            pl.BlockSpec(wslab.shape, lambda i: (0, 0)),   # resident across tiles
            pl.BlockSpec(mslab.shape, lambda i: (0, 0)),   # resident across tiles
        ],
        out_specs=(
            pl.BlockSpec((tile_b, L), lambda i: (i, 0)),
            pl.BlockSpec((8, 128), lambda i: (i, 0)),
        ),
        compiler_params=pltpu.CompilerParams(
            dimension_semantics=("parallel",)),
        cost_estimate=pl.CostEstimate(
            flops=int(flops), transcendentals=0,
            bytes_accessed=int(bytes_accessed)),
    )(x_flat, wslab, mslab)

    recon = recon_pad[:B].reshape(B, 1, L)
    sq_sum = jnp.sum(loss_part[::8, 0])                       # one partial per tile
    vq_loss = (1.0 + cfg["commitment_cost"]) * sq_sum / (B * D)
    return recon, vq_loss


# TODO(synk): straight-through estimator / loss detach() only affect gradients;
# this script reproduces the forward values (recon, vq_loss) exactly.

if __name__ == "__main__":
    cfg = make_config()
    key = jax.random.PRNGKey(0)
    pkey, xkey = jax.random.split(key)
    params = init_params(pkey, cfg)
    prep = prepare_params(params, cfg)           # one-time folding + slab packing
    x = jax.random.normal(xkey, (2, 1, cfg["input_dim"]), dtype=jnp.float32)

    fwd = jax.jit(functools.partial(conv_vqvae_forward, cfg=cfg))
    recon, vq_loss = fwd(prep, x)
    jax.block_until_ready((recon, vq_loss))

    assert recon.shape == (2, 1, cfg["input_dim"]), recon.shape
    assert vq_loss.shape == (), vq_loss.shape
    assert bool(jnp.isfinite(recon).all()) and bool(jnp.isfinite(vq_loss))
    print("KERNEL_OK")
</pallas_src>

<mosaic_0001>
module attributes {stable_mosaic.version = 11 : i64} {
  func.func @_fused_kernel(%arg0: i32, %arg1: memref<8x16xf32, #tpu.memory_space<vmem>>, %arg2: memref<512x128xbf16, #tpu.memory_space<vmem>>, %arg3: memref<56x128xf32, #tpu.memory_space<vmem>>, %arg4: memref<8x16xf32, #tpu.memory_space<vmem>>, %arg5: memref<8x128xf32, #tpu.memory_space<vmem>>) attributes {dimension_semantics = [#tpu.dimension_semantics<parallel>], iteration_bounds = array<i64: 1>, scalar_prefetch = 0 : i64, scratch_operands = 0 : i64, tpu.core_type = #tpu.core_type<tc>, window_params = [{transform_indices = @transform_0, window_bounds = array<i64: 8, 16>}, {pipeline_mode = #tpu.pipeline_mode<synchronous>, transform_indices = @transform_1, window_bounds = array<i64: 512, 128>}, {pipeline_mode = #tpu.pipeline_mode<synchronous>, transform_indices = @transform_2, window_bounds = array<i64: 56, 128>}, {transform_indices = @transform_3, window_bounds = array<i64: 8, 16>}, {transform_indices = @transform_4, window_bounds = array<i64: 8, 128>}]} {
    %c0 = arith.constant 0 : index
    %c0_0 = arith.constant 0 : index
    %0 = vector.load %arg1[%c0, %c0_0] : memref<8x16xf32, #tpu.memory_space<vmem>>, vector<8x16xf32>
    %1 = arith.truncf %0 : vector<8x16xf32> to vector<8x16xbf16>
    %c0_1 = arith.constant 0 : index
    %c0_2 = arith.constant 0 : index
    %2 = vector.load %arg2[%c0_1, %c0_2] : memref<512x128xbf16, #tpu.memory_space<vmem>>, vector<16x64xbf16>
    %cst = arith.constant dense<0.000000e+00> : vector<8x64xf32>
    %3 = tpu.matmul %1, %2, %cst {dimension_numbers = #tpu.dot_dimension_numbers<[1], [0], [0], [1], [0, 0, 1, 1], [], []>} : vector<8x16xbf16>, vector<16x64xbf16>, vector<8x64xf32> -> vector<8x64xf32>
    %c0_3 = arith.constant 0 : index
    %c0_4 = arith.constant 0 : index
    %4 = vector.load %arg3[%c0_3, %c0_4] : memref<56x128xf32, #tpu.memory_space<vmem>>, vector<1x64xf32>
    %5 = vector.broadcast %4 : vector<1x64xf32> to vector<8x64xf32>
    %6 = arith.addf %3, %5 : vector<8x64xf32>
    %cst_5 = arith.constant 0.000000e+00 : f32
    %7 = vector.broadcast %cst_5 : f32 to vector<8x64xf32>
    %8 = arith.maximumf %6, %7 : vector<8x64xf32>
    %9 = arith.truncf %8 : vector<8x64xf32> to vector<8x64xbf16>
    %c16 = arith.constant 16 : index
    %c0_6 = arith.constant 0 : index
    %10 = vector.load %arg2[%c16, %c0_6] : memref<512x128xbf16, #tpu.memory_space<vmem>>, vector<64x64xbf16>
    %cst_7 = arith.constant dense<0.000000e+00> : vector<8x64xf32>
    %11 = tpu.matmul %9, %10, %cst_7 {dimension_numbers = #tpu.dot_dimension_numbers<[1], [0], [0], [1], [0, 0, 1, 1], [], []>} : vector<8x64xbf16>, vector<64x64xbf16>, vector<8x64xf32> -> vector<8x64xf32>
    %c1 = arith.constant 1 : index
    %c0_8 = arith.constant 0 : index
    %12 = vector.load %arg3[%c1, %c0_8] : memref<56x128xf32, #tpu.memory_space<vmem>>, vector<1x64xf32>
    %13 = vector.broadcast %12 : vector<1x64xf32> to vector<8x64xf32>
    %14 = arith.addf %11, %13 : vector<8x64xf32>
    %cst_9 = arith.constant 0.000000e+00 : f32
    %15 = vector.broadcast %cst_9 : f32 to vector<8x64xf32>
    %16 = arith.maximumf %14, %15 : vector<8x64xf32>
    %17 = arith.truncf %16 : vector<8x64xf32> to vector<8x64xbf16>
    %c80 = arith.constant 80 : index
    %c0_10 = arith.constant 0 : index
    %18 = vector.load %arg2[%c80, %c0_10] : memref<512x128xbf16, #tpu.memory_space<vmem>>, vector<64x64xbf16>
    %cst_11 = arith.constant dense<0.000000e+00> : vector<8x64xf32>
    %19 = tpu.matmul %17, %18, %cst_11 {dimension_numbers = #tpu.dot_dimension_numbers<[1], [0], [0], [1], [0, 0, 1, 1], [], []>} : vector<8x64xbf16>, vector<64x64xbf16>, vector<8x64xf32> -> vector<8x64xf32>
    %c2 = arith.constant 2 : index
    %c0_12 = arith.constant 0 : index
    %20 = vector.load %arg3[%c2, %c0_12] : memref<56x128xf32, #tpu.memory_space<vmem>>, vector<1x64xf32>
    %21 = vector.broadcast %20 : vector<1x64xf32> to vector<8x64xf32>
    %22 = arith.addf %19, %21 : vector<8x64xf32>
    %cst_13 = arith.constant 0.000000e+00 : f32
    %23 = vector.broadcast %cst_13 : f32 to vector<8x64xf32>
    %24 = arith.maximumf %22, %23 : vector<8x64xf32>
    %25 = arith.truncf %24 : vector<8x64xf32> to vector<8x64xbf16>
    %c144 = arith.constant 144 : index
    %c0_14 = arith.constant 0 : index
    %26 = vector.load %arg2[%c144, %c0_14] : memref<512x128xbf16, #tpu.memory_space<vmem>>, vector<64x32xbf16>
    %cst_15 = arith.constant dense<0.000000e+00> : vector<8x32xf32>
    %27 = tpu.matmul %25, %26, %cst_15 {dimension_numbers = #tpu.dot_dimension_numbers<[1], [0], [0], [1], [0, 0, 1, 1], [], []>} : vector<8x64xbf16>, vector<64x32xbf16>, vector<8x32xf32> -> vector<8x32xf32>
    %c3 = arith.constant 3 : index
    %c0_16 = arith.constant 0 : index
    %28 = vector.load %arg3[%c3, %c0_16] : memref<56x128xf32, #tpu.memory_space<vmem>>, vector<1x32xf32>
    %29 = vector.broadcast %28 : vector<1x32xf32> to vector<8x32xf32>
    %30 = arith.addf %27, %29 : vector<8x32xf32>
    %cst_17 = arith.constant 0.000000e+00 : f32
    %31 = vector.broadcast %cst_17 : f32 to vector<8x32xf32>
    %32 = arith.maximumf %30, %31 : vector<8x32xf32>
    %33 = arith.truncf %32 : vector<8x32xf32> to vector<8x32xbf16>
    %c208 = arith.constant 208 : index
    %c0_18 = arith.constant 0 : index
    %34 = vector.load %arg2[%c208, %c0_18] : memref<512x128xbf16, #tpu.memory_space<vmem>>, vector<32x8xbf16>
    %cst_19 = arith.constant dense<0.000000e+00> : vector<8x8xf32>
    %35 = tpu.matmul %33, %34, %cst_19 {dimension_numbers = #tpu.dot_dimension_numbers<[1], [0], [0], [1], [0, 0, 1, 1], [], []>} : vector<8x32xbf16>, vector<32x8xbf16>, vector<8x8xf32> -> vector<8x8xf32>
    %c4 = arith.constant 4 : index
    %c0_20 = arith.constant 0 : index
    %36 = vector.load %arg3[%c4, %c0_20] : memref<56x128xf32, #tpu.memory_space<vmem>>, vector<1x8xf32>
    %37 = vector.broadcast %36 : vector<1x8xf32> to vector<8x8xf32>
    %38 = arith.addf %35, %37 : vector<8x8xf32>
    %c16_21 = arith.constant 16 : index
    %c0_22 = arith.constant 0 : index
    %39 = vector.load %arg3[%c16_21, %c0_22] : memref<56x128xf32, #tpu.memory_space<vmem>>, vector<8x32xf32>
    %c24 = arith.constant 24 : index
    %c0_23 = arith.constant 0 : index
    %40 = vector.load %arg3[%c24, %c0_23] : memref<56x128xf32, #tpu.memory_space<vmem>>, vector<32x8xf32>
    %41 = arith.mulf %38, %38 : vector<8x8xf32>
    %cst_24 = arith.constant dense<0.000000e+00> : vector<8xf32>
    %42 = vector.multi_reduction <add>, %41, %cst_24 [1] : vector<8x8xf32> to vector<8xf32>
    %43 = vector.shape_cast %42 : vector<8xf32> to vector<8x1xf32>
    %cst_25 = arith.constant dense<0.000000e+00> : vector<8x32xf32>
    %44 = tpu.matmul %38, %39, %cst_25 {dimension_numbers = #tpu.dot_dimension_numbers<[1], [0], [0], [1], [0, 0, 1, 1], [], []>} : vector<8x8xf32>, vector<8x32xf32>, vector<8x32xf32> -> vector<8x32xf32>
    %c10 = arith.constant 10 : index
    %c0_26 = arith.constant 0 : index
    %45 = vector.load %arg3[%c10, %c0_26] : memref<56x128xf32, #tpu.memory_space<vmem>>, vector<1x32xf32>
    %46 = vector.broadcast %43 : vector<8x1xf32> to vector<8x32xf32>
    %47 = vector.broadcast %45 : vector<1x32xf32> to vector<8x32xf32>
    %48 = arith.addf %46, %47 : vector<8x32xf32>
    %cst_27 = arith.constant 2.000000e+00 : f32
    %49 = vector.broadcast %cst_27 : f32 to vector<8x32xf32>
    %50 = arith.mulf %49, %44 : vector<8x32xf32>
    %51 = arith.subf %48, %50 : vector<8x32xf32>
    %cst_28 = arith.constant dense<0x7F800000> : vector<8xf32>
    %52 = vector.multi_reduction <minimumf>, %51, %cst_28 [1] : vector<8x32xf32> to vector<8xf32>
    %53 = vector.shape_cast %52 : vector<8xf32> to vector<8x1xf32>
    %54 = tpu.iota {dimensions = array<i32: 1>} : vector<8x32xi32>
    %55 = vector.broadcast %53 : vector<8x1xf32> to vector<8x32xf32>
    %56 = arith.cmpf ole, %51, %55 : vector<8x32xf32>
    %c32_i32 = arith.constant 32 : i32
    %57 = vector.broadcast %c32_i32 : i32 to vector<8x32xi32>
    %58 = arith.select %56, %54, %57 : vector<8x32xi1>, vector<8x32xi32>
    %cst_29 = arith.constant dense<2147483647> : vector<8xi32>
    %59 = vector.multi_reduction <minsi>, %58, %cst_29 [1] : vector<8x32xi32> to vector<8xi32>
    %60 = vector.shape_cast %59 : vector<8xi32> to vector<8x1xi32>
    %61 = vector.broadcast %60 : vector<8x1xi32> to vector<8x32xi32>
    %62 = arith.cmpi eq, %54, %61 : vector<8x32xi32>
    %63 = arith.extui %62 : vector<8x32xi1> to vector<8x32xi32>
    %64 = arith.sitofp %63 : vector<8x32xi32> to vector<8x32xf32>
    %cst_30 = arith.constant dense<0.000000e+00> : vector<8x8xf32>
    %65 = tpu.matmul %64, %40, %cst_30 {dimension_numbers = #tpu.dot_dimension_numbers<[1], [0], [0], [1], [0, 0, 1, 1], [], []>} : vector<8x32xf32>, vector<32x8xf32>, vector<8x8xf32> -> vector<8x8xf32>
    %c8_i32 = arith.constant 8 : i32
    %66 = arith.muli %arg0, %c8_i32 : i32
    %67 = tpu.iota {dimensions = array<i32: 0>} : vector<8x1xi32>
    %68 = vector.broadcast %66 : i32 to vector<8x1xi32>
    %69 = arith.addi %68, %67 : vector<8x1xi32>
    %c2_i32 = arith.constant 2 : i32
    %70 = vector.broadcast %c2_i32 : i32 to vector<8x1xi32>
    %71 = arith.cmpi slt, %69, %70 : vector<8x1xi32>
    %72 = arith.extui %71 : vector<8x1xi1> to vector<8x1xi32>
    %73 = arith.sitofp %72 : vector<8x1xi32> to vector<8x1xf32>
    %74 = arith.subf %65, %38 : vector<8x8xf32>
    %75 = arith.mulf %74, %74 : vector<8x8xf32>
    %76 = vector.broadcast %73 : vector<8x1xf32> to vector<8x8xf32>
    %77 = arith.mulf %75, %76 : vector<8x8xf32>
    %78 = vector.shape_cast %77 : vector<8x8xf32> to vector<1x8x8xf32>
    %cst_31 = arith.constant dense<0.000000e+00> : vector<1xf32>
    %79 = vector.multi_reduction <add>, %78, %cst_31 [1, 2] : vector<1x8x8xf32> to vector<1xf32>
    %80 = vector.shape_cast %79 : vector<1xf32> to vector<1x1x1xf32>
    %81 = vector.extract %80[0, 0, 0] : f32 from vector<1x1x1xf32>
    %82 = vector.broadcast %81 : f32 to vector<8x128xf32>
    %c0_32 = arith.constant 0 : index
    %c0_33 = arith.constant 0 : index
    %83 = vector.load %arg5[%c0_32, %c0_33] : memref<8x128xf32, #tpu.memory_space<vmem>>, vector<8x128xf32>
    tpu.vector_store %arg5[%c0_32, %c0_33], %82 {strides = array<i32>} : memref<8x128xf32, #tpu.memory_space<vmem>>, vector<8x128xf32>,
    %84 = arith.truncf %65 : vector<8x8xf32> to vector<8x8xbf16>
    %c240 = arith.constant 240 : index
    %c0_34 = arith.constant 0 : index
    %85 = vector.load %arg2[%c240, %c0_34] : memref<512x128xbf16, #tpu.memory_space<vmem>>, vector<8x64xbf16>
    %cst_35 = arith.constant dense<0.000000e+00> : vector<8x64xf32>
    %86 = tpu.matmul %84, %85, %cst_35 {dimension_numbers = #tpu.dot_dimension_numbers<[1], [0], [0], [1], [0, 0, 1, 1], [], []>} : vector<8x8xbf16>, vector<8x64xbf16>, vector<8x64xf32> -> vector<8x64xf32>
    %c5 = arith.constant 5 : index
    %c0_36 = arith.constant 0 : index
    %87 = vector.load %arg3[%c5, %c0_36] : memref<56x128xf32, #tpu.memory_space<vmem>>, vector<1x64xf32>
    %88 = vector.broadcast %87 : vector<1x64xf32> to vector<8x64xf32>
    %89 = arith.addf %86, %88 : vector<8x64xf32>
    %cst_37 = arith.constant 0.000000e+00 : f32
    %90 = vector.broadcast %cst_37 : f32 to vector<8x64xf32>
    %91 = arith.maximumf %89, %90 : vector<8x64xf32>
    %92 = arith.truncf %91 : vector<8x64xf32> to vector<8x64xbf16>
    %c256 = arith.constant 256 : index
    %c0_38 = arith.constant 0 : index
    %93 = vector.load %arg2[%c256, %c0_38] : memref<512x128xbf16, #tpu.memory_space<vmem>>, vector<64x64xbf16>
    %cst_39 = arith.constant dense<0.000000e+00> : vector<8x64xf32>
    %94 = tpu.matmul %92, %93, %cst_39 {dimension_numbers = #tpu.dot_dimension_numbers<[1], [0], [0], [1], [0, 0, 1, 1], [], []>} : vector<8x64xbf16>, vector<64x64xbf16>, vector<8x64xf32> -> vector<8x64xf32>
    %c6 = arith.constant 6 : index
    %c0_40 = arith.constant 0 : index
    %95 = vector.load %arg3[%c6, %c0_40] : memref<56x128xf32, #tpu.memory_space<vmem>>, vector<1x64xf32>
    %96 = vector.broadcast %95 : vector<1x64xf32> to vector<8x64xf32>
    %97 = arith.addf %94, %96 : vector<8x64xf32>
    %cst_41 = arith.constant 0.000000e+00 : f32
    %98 = vector.broadcast %cst_41 : f32 to vector<8x64xf32>
    %99 = arith.maximumf %97, %98 : vector<8x64xf32>
    %100 = arith.truncf %99 : vector<8x64xf32> to vector<8x64xbf16>
    %c320 = arith.constant 320 : index
    %c0_42 = arith.constant 0 : index
    %101 = vector.load %arg2[%c320, %c0_42] : memref<512x128xbf16, #tpu.memory_space<vmem>>, vector<64x64xbf16>
    %cst_43 = arith.constant dense<0.000000e+00> : vector<8x64xf32>
    %102 = tpu.matmul %100, %101, %cst_43 {dimension_numbers = #tpu.dot_dimension_numbers<[1], [0], [0], [1], [0, 0, 1, 1], [], []>} : vector<8x64xbf16>, vector<64x64xbf16>, vector<8x64xf32> -> vector<8x64xf32>
    %c7 = arith.constant 7 : index
    %c0_44 = arith.constant 0 : index
    %103 = vector.load %arg3[%c7, %c0_44] : memref<56x128xf32, #tpu.memory_space<vmem>>, vector<1x64xf32>
    %104 = vector.broadcast %103 : vector<1x64xf32> to vector<8x64xf32>
    %105 = arith.addf %102, %104 : vector<8x64xf32>
    %cst_45 = arith.constant 0.000000e+00 : f32
    %106 = vector.broadcast %cst_45 : f32 to vector<8x64xf32>
    %107 = arith.maximumf %105, %106 : vector<8x64xf32>
    %108 = arith.truncf %107 : vector<8x64xf32> to vector<8x64xbf16>
    %c384 = arith.constant 384 : index
    %c0_46 = arith.constant 0 : index
    %109 = vector.load %arg2[%c384, %c0_46] : memref<512x128xbf16, #tpu.memory_space<vmem>>, vector<64x64xbf16>
    %cst_47 = arith.constant dense<0.000000e+00> : vector<8x64xf32>
    %110 = tpu.matmul %108, %109, %cst_47 {dimension_numbers = #tpu.dot_dimension_numbers<[1], [0], [0], [1], [0, 0, 1, 1], [], []>} : vector<8x64xbf16>, vector<64x64xbf16>, vector<8x64xf32> -> vector<8x64xf32>
    %c8 = arith.constant 8 : index
    %c0_48 = arith.constant 0 : index
    %111 = vector.load %arg3[%c8, %c0_48] : memref<56x128xf32, #tpu.memory_space<vmem>>, vector<1x64xf32>
    %112 = vector.broadcast %111 : vector<1x64xf32> to vector<8x64xf32>
    %113 = arith.addf %110, %112 : vector<8x64xf32>
    %cst_49 = arith.constant 0.000000e+00 : f32
    %114 = vector.broadcast %cst_49 : f32 to vector<8x64xf32>
    %115 = arith.maximumf %113, %114 : vector<8x64xf32>
    %116 = arith.truncf %115 : vector<8x64xf32> to vector<8x64xbf16>
    %c448 = arith.constant 448 : index
    %c0_50 = arith.constant 0 : index
    %117 = vector.load %arg2[%c448, %c0_50] : memref<512x128xbf16, #tpu.memory_space<vmem>>, vector<64x16xbf16>
    %cst_51 = arith.constant dense<0.000000e+00> : vector<8x16xf32>
    %118 = tpu.matmul %116, %117, %cst_51 {dimension_numbers = #tpu.dot_dimension_numbers<[1], [0], [0], [1], [0, 0, 1, 1], [], []>} : vector<8x64xbf16>, vector<64x16xbf16>, vector<8x16xf32> -> vector<8x16xf32>
    %c9 = arith.constant 9 : index
    %c0_52 = arith.constant 0 : index
    %119 = vector.load %arg3[%c9, %c0_52] : memref<56x128xf32, #tpu.memory_space<vmem>>, vector<1x16xf32>
    %120 = vector.broadcast %119 : vector<1x16xf32> to vector<8x16xf32>
    %121 = arith.addf %118, %120 : vector<8x16xf32>
    %c0_53 = arith.constant 0 : index
    %c0_54 = arith.constant 0 : index
    %122 = vector.load %arg4[%c0_53, %c0_54] : memref<8x16xf32, #tpu.memory_space<vmem>>, vector<8x16xf32>
    tpu.vector_store %arg4[%c0_53, %c0_54], %121 {strides = array<i32>} : memref<8x16xf32, #tpu.memory_space<vmem>>, vector<8x16xf32>,
    return
  }
  func.func @transform_0(%arg0: i32) -> (i32, i32) {
    %c0_i32 = arith.constant 0 : i32
    %c0_i32_0 = arith.constant 0 : i32
    return %arg0, %c0_i32 : i32, i32
  }
  func.func @transform_1(%arg0: i32) -> (i32, i32) {
    %c0_i32 = arith.constant 0 : i32
    %c0_i32_0 = arith.constant 0 : i32
    %c0_i32_1 = arith.constant 0 : i32
    return %c0_i32, %c0_i32_0 : i32, i32
  }
  func.func @transform_2(%arg0: i32) -> (i32, i32) {
    %c0_i32 = arith.constant 0 : i32
    %c0_i32_0 = arith.constant 0 : i32
    %c0_i32_1 = arith.constant 0 : i32
    return %c0_i32, %c0_i32_0 : i32, i32
  }
  func.func @transform_3(%arg0: i32) -> (i32, i32) {
    %c0_i32 = arith.constant 0 : i32
    %c0_i32_0 = arith.constant 0 : i32
    return %arg0, %c0_i32 : i32, i32
  }
  func.func @transform_4(%arg0: i32) -> (i32, i32) {
    %c0_i32 = arith.constant 0 : i32
    %c0_i32_0 = arith.constant 0 : i32
    return %arg0, %c0_i32 : i32, i32
  }
}

</mosaic_0001>

<bundles_post_ra>
// kernel: conv_vqvae_forward.1
= control target key start
LH: loop header
LB: loop body
LE: loop exit
PB: predicated region body
PF: predicated region fallthrough
CT: control target
= control target key end

     0   :  { %10 = vsyncpa [#allocation3], 0  ;;  %s1487_s0 = inlined_call_operand.vmem [shape: f32[8,16], index: 0, kind: input, shape index: {}]   ;;  %s1488_s1 = inlined_call_operand.hbm [shape: bf16[512,128], index: 1, kind: input, shape index: {}]   ;;  %s1489_s2 = inlined_call_operand.hbm [shape: f32[56,128], index: 2, kind: input, shape index: {}]   ;;  %s1490_s3 = inlined_call_operand.vmem [shape: f32[8,16], index: 3, kind: output, shape index: {0}]   ;;  %s1491_s4 = inlined_call_operand.vmem [shape: f32[8,128], index: 4, kind: output, shape index: {1}]  }
   0x1   :  { %11 = vsyncpa [#allocation5], 0  ;;  %s1344_s15 = smov [#allocation2]   ;;  %s1296_s19 = scalar_lea.hbm %s1488_s1, 4096 }
   0x2   :  { %s19_s16 = sshll.u32 %s1344_s15, 4  ;;  %p1297_p0 = scmp.ne.s32.totalorder %s1488_s1, %s1296_s19  ;;  %s20_s16 = int_to_ptr.vmem [resolvable:$true] %s19_s16 }
   0x3   :  { %p1300_p1 = scmp.lt.u32.totalorder %s1296_s19, %s1488_s1 }
   0x5   :  { %p1302_p2 = pnand %p1300_p1, %p1297_p0 }
   0x7   :  { %1305 = shalt.err (!%p1302_p2)
}
   0x8   :  { %s1306_s24 = scalar_lea.vmem %s20_s16, 4096  ;;  %p1311_p4 = scmp.lt.s32.totalorder %s20_s16, %s20_s16 }
   0x9   :  { %p1307_p3 = scmp.ne.s32.totalorder %s20_s16, %s1306_s24  ;;  %p1312_p5 = scmp.lt.s32.totalorder %s1306_s24, %s1306_s24 }
   0xb   :  { %p1313_p6 = por %p1312_p5, %p1311_p4 }
   0xd   :  { %p1314_p7 = pnand %p1313_p6, %p1307_p3 }
   0xf   :  { %1317 = shalt.err (!%p1314_p7)
}
  0x10   :  { %s1345_s25 = smov 64   ;;  %s1346_s26 = smov 4  }
  0x11   :  { %25 = dma.hbm_to_vmem [thread:$0]  %s1488_s1, 4096, %s20_s16, [#allocation3], %s1345_s25, %s1345_s25, %s1346_s26  }
  0x12   :  { %s1347_s29 = smov [#allocation4]   ;;  %s1318_s7 = scalar_lea.hbm %s1489_s2, 896 }
  0x13   :  { %s31_s30 = sshll.u32 %s1347_s29, 4  ;;  %p1319_p8 = scmp.ne.s32.totalorder %s1489_s2, %s1318_s7  ;;  %s32_s30 = int_to_ptr.vmem [resolvable:$true] %s31_s30 }
  0x14   :  { %p1322_p9 = scmp.lt.u32.totalorder %s1318_s7, %s1489_s2 }
  0x16   :  { %p1324_p10 = pnand %p1322_p9, %p1319_p8 }
  0x18   :  { %1327 = shalt.err (!%p1324_p10)
}
  0x19   :  { %s1328_s12 = scalar_lea.vmem %s32_s30, 896  ;;  %p1333_p12 = scmp.lt.s32.totalorder %s32_s30, %s32_s30 }
  0x1a   :  { %p1329_p11 = scmp.ne.s32.totalorder %s32_s30, %s1328_s12  ;;  %p1334_p13 = scmp.lt.s32.totalorder %s1328_s12, %s1328_s12 }
  0x1c   :  { %p1335_p0 = por %p1334_p13, %p1333_p12 }
  0x1e   :  { %p1336_p1 = pnand %p1335_p0, %p1329_p11 }
  0x20   :  { %1339 = shalt.err (!%p1336_p1)
}
  0x21   :  { %s1348_s1 = smov 128   ;;  %s1349_s13 = smov 8  }
  0x22   :  { %37 = dma.hbm_to_vmem [thread:$0]  %s1489_s2, 896, %s32_s30, [#allocation5], %s1348_s1, %s1348_s1, %s1349_s13  }
  0x23   :  { %1340 = dma.done.wait [#allocation3], 4096  }
  0x24   :  { %1341 = vsyncadd [#allocation3], 4294963200 }
  0x25   :  { %1342 = dma.done.wait [#allocation5], 896  }
  0x26   :  { %1343 = vsyncadd [#allocation5], 4294966400  ;;  %v1350_v0 = vmov 0.0   ;;  %vm1351_vm0 = vmmov 0   ;;  %v1265_v1 = vld [vmem:[#allocation2] sm:$0xff]   ;;  %vm60_vm1 = vcmask 130048  }
  0x27   :  { %1128 = vmatprep.subr.bf16.mxu0 %v1350_v0  ;;  %1130 = vmatprep.mubr.msk.bf16.mxu0 %vm1351_vm0, %v1350_v0  ;;  %v45_v2 = vld [vmem:[%s1487_s0] sm:$0xff]  ;;  %v1266_v4 = vld [vmem:[#allocation2 + $0x8] sm:$0xff]   ;;  %v1267_v5 = vld [vmem:[#allocation2 + $0x10] sm:$0xff]   ;;  %vm143_vm2 = vcmask 523264   ;;  %vm374_vm3 = vcmask 261120   ;;  %vm424_vm4 = vcmask 64512  }
  0x28   :  { %1134 = vmatprep.subr.bf16.mxu1 %v1350_v0  ;;  %1142 = vmatprep.mubr.msk.bf16.mxu1 %vm1351_vm0, %v1350_v0  ;;  %v46_v3 = vpack.c.bf16 %v45_v2, %v45_v2  ;;  %v1268_v6 = vld [vmem:[#allocation2 + $0x18] sm:$0xff]   ;;  %v1269_v7 = vld [vmem:[#allocation2 + $0x20] sm:$0xff]   ;;  %v1270_v8 = vld [vmem:[#allocation2 + $0x28] sm:$0xff]   ;;  %vm640_vm7 = vcmask 1043456  }
  0x29   :  { %1129 = vmatpush3.bf16.msra.mxu0 %v1265_v1  ;;  %1135 = vmatpush3.bf16.msra.mxu1 %v1266_v4  ;;  %v1271_v9 = vld [vmem:[#allocation2 + $0x30] sm:$0xff]   ;;  %v1023_v10 = vld [vmem:[#allocation4] ss:$0 sm:$0xff]  ;;  %v1272_v18 = vld [vmem:[#allocation2 + $0x38] sm:$0xff]   ;;  %v512_v4 = vlaneseq }
  0x2a   :  { %1146 = vmatprep.subr.bf16.mxu0 %v1350_v0  ;;  %1136 = vmatprep.subr.bf16.mxu1 %v1350_v0  ;;  %v1273_v19 = vld [vmem:[#allocation2 + $0x40] sm:$0xff]   ;;  %v1274_v20 = vld [vmem:[#allocation2 + $0x48] sm:$0xff]   ;;  %v1275_v21 = vld [vmem:[#allocation2 + $0x50] sm:$0xff]  }
  0x2b   :  { %v1026_v22 = vld [vmem:[#allocation4 + $0x1] ss:$0 sm:$0xff]  ;;  %v1276_v30 = vld [vmem:[#allocation2 + $0x58] sm:$0xff]   ;;  %v1278_v32 = vld [vmem:[#allocation2 + $0x68] sm:$0xff]  }
  0x2c   :  { %1131 = vmatmul.mubr.msk.bf16.vlgmr.msra.gmra.mrb[0].mxu0 %vm60_vm1, %v46_v3  ;;  %v1277_v31 = vld [vmem:[#allocation2 + $0x60] sm:$0xff]   ;;  %v1279_v41 = vld [vmem:[#allocation2 + $0x70] sm:$0xff]   ;;  %v1049_v59 = vld [vmem:[#allocation4 + $0xa] ss:$0 sm:$0xff] }
  0x2d   :  { %1154 = vmatprep.mubr.msk.bf16.mxu0 %vm1351_vm0, %v1350_v0  ;;  %1137 = vmatpush3.bf16.msra.mxu1 %v1267_v5  ;;  %v1032_v33 = vld [vmem:[#allocation4 + $0x2] ss:$0 sm:$0xff]  ;;  %v1038_v42 = vld [vmem:[#allocation4 + $0x3] ss:$0 sm:$0xff]  ;;  %v418_v50 = vld [vmem:[#allocation4 + $0x10] sm:$0xff]  ;;  %v513_v5 = vand.u32 127, %v512_v4 }
  0x2e   :  { %1138 = vmatprep.subr.bf16.mxu1 %v1350_v0  ;;  %1147 = vmatpush3.bf16.msra.mxu0 %v1270_v8  ;;  %v1044_v51 = vld [vmem:[#allocation4 + $0x4] ss:$0 sm:$0xff] }
  0x2f   :  { %1148 = vmatprep.subr.bf16.mxu0 %v1350_v0 }
  0x31   :  { %1139 = vmatpush3.bf16.msra.mxu1 %v1268_v6 }
  0x32   :  { %1140 = vmatprep.subr.bf16.mxu1 %v1350_v0  ;;  %1149 = vmatpush3.bf16.msra.mxu0 %v1271_v9 }
  0x33   :  { %1150 = vmatprep.subr.bf16.mxu0 %v1350_v0 }
  0x35   :  { %1141 = vmatpush3.bf16.msra.mxu1 %v1269_v7 }
  0x36   :  { %1158 = vmatprep.subr.bf16.mxu1 %v1350_v0  ;;  %1151 = vmatpush3.bf16.msra.mxu0 %v1272_v18 }
  0x37   :  { %1152 = vmatprep.subr.bf16.mxu0 %v1350_v0 }
  0x3a   :  { %1153 = vmatpush3.bf16.msra.mxu0 %v1273_v19  ;;  %v421_v19 = vld [vmem:[#allocation4 + $0x28] sm:$0xff] }
  0x3b   :  { %1170 = vmatprep.subr.bf16.mxu0 %v1350_v0 }
  0xff   :  { %v98_v11 = vpop.f32.mrb[0].mxu0 }
 0x100   :  { %v99_v12 = vadd.f32 %v1023_v10, %v98_v11  ;;  %v1132_v13 = vpop.f32.mrb[1].mxu0  ;;  %v419_v11 = vld [vmem:[#allocation4 + $0x18] sm:$0xff] }
 0x101   :  { %v101_v14 = vpop.f32.mrb[2].mxu0  ;;  %v1352_v13 = vmov 0.0|0.0  }
 0x102   :  { %v104_v15 = vmax.f32 %v99_v12, 0.0  ;;  %v1133_v16 = vpop.f32.mrb[3].mxu0  ;;  %v420_v12 = vld [vmem:[#allocation4 + $0x20] sm:$0xff] }
 0x103   :  { %v1249_v14 = vpack.c.bf16 %v420_v12, %v419_v11  ;;  %v1291_v11 = vld [vmem:[#allocation2 + $0xd8] sm:$0xff]   ;;  %v1292_v12 = vld [vmem:[#allocation2 + $0xe0] sm:$0xff]  }
 0x104   :  { %v105_v17 = vpack.c.bf16 %v104_v15, %v104_v15 }
 0x106   :  { %1143 = vmatmul.mubr.msk.bf16.vlgmr.msra.gmra.mrb[0].mxu1 %vm143_vm2, %v105_v17 }
 0x107   :  { %1166 = vmatprep.mubr.msk.bf16.mxu1 %vm1351_vm0, %v1350_v0  ;;  %1159 = vmatpush3.bf16.msra.mxu1 %v1274_v20  ;;  %v422_v20 = vld [vmem:[#allocation4 + $0x30] sm:$0xff] }
 0x108   :  { %1160 = vmatprep.subr.bf16.mxu1 %v1350_v0 }
 0x10b   :  { %1161 = vmatpush3.bf16.msra.mxu1 %v1275_v21  ;;  %v1252_v21 = vpack.c.bf16 %v422_v20, %v421_v19 }
 0x10c   :  { %1162 = vmatprep.subr.bf16.mxu1 %v1350_v0 }
 0x10f   :  { %1163 = vmatpush3.bf16.msra.mxu1 %v1276_v30  ;;  %v609_v30 = vshrl.u32 %v512_v4, 7 }
 0x110   :  { %1164 = vmatprep.subr.bf16.mxu1 %v1350_v0 }
 0x111   :  { %vm612_vm9 = vcmp.lt.s32.totalorder %v609_v30, 2 }
 0x113   :  { %1165 = vmatpush3.bf16.msra.mxu1 %v1277_v31 }
 0x114   :  { %1248 = vmatprep.subr.bf16.mxu1 %v1352_v13 }
 0x1d9   :  { %v181_v23 = vpop.f32.mrb[0].mxu1 }
 0x1da   :  { %v182_v24 = vadd.f32 %v1026_v22, %v181_v23  ;;  %v1144_v25 = vpop.f32.mrb[1].mxu1  ;;  %v631_v22 = vld [vmem:[#allocation2 + $0x78] sm:$0xf] }
 0x1db   :  { %v184_v26 = vpop.f32.mrb[2].mxu1  ;;  %v642_v23 = vsel %vm640_vm7, %v631_v22, 0  ;;  %v1294_v22 = vld [vmem:[#allocation2 + $0xf0] sm:$0xff]  }
 0x1dc   :  { %v187_v27 = vmax.f32 %v182_v24, 0.0  ;;  %v1145_v28 = vpop.f32.mrb[3].mxu1 }
 0x1de   :  { %v188_v29 = vpack.c.bf16 %v187_v27, %v187_v27 }
 0x1e0   :  { %1155 = vmatmul.mubr.msk.bf16.vlgmr.msra.gmra.mrb[4].mxu0 %vm143_vm2, %v188_v29 }
 0x1e1   :  { %1174 = vmatprep.mubr.msk.bf16.mxu0 %vm1351_vm0, %v1350_v0  ;;  %1171 = vmatpush3.bf16.msra.mxu0 %v1278_v32 }
 0x1e2   :  { %1172 = vmatprep.subr.bf16.mxu0 %v1350_v0 }
 0x1e5   :  { %1173 = vmatpush3.bf16.msra.mxu0 %v1279_v41  ;;  %v1282_v41 = vld [vmem:[#allocation2 + $0x90] sm:$0xff]  }
 0x1e6   :  { %1178 = vmatprep.subr.mxu0 %v1350_v0 }
 0x2b3   :  { %v263_v34 = vpop.f32.mrb[4].mxu0 }
 0x2b4   :  { %v264_v35 = vadd.f32 %v1032_v33, %v263_v34  ;;  %v1156_v36 = vpop.f32.mrb[5].mxu0 }
 0x2b5   :  { %v266_v37 = vpop.f32.mrb[6].mxu0 }
 0x2b6   :  { %v269_v38 = vmax.f32 %v264_v35, 0.0  ;;  %v1157_v39 = vpop.f32.mrb[7].mxu0  ;;  %v1052_v35 = vsel %vm612_vm9, 1.0, %v1350_v0 }
 0x2b7   :  { %v1280_v39 = vld [vmem:[#allocation2 + $0x80] sm:$0xff]  }
 0x2b8   :  { %v270_v40 = vpack.c.bf16 %v269_v38, %v269_v38 }
 0x2ba   :  { %1167 = vmatmul.mubr.msk.bf16.vlgmr.msra.gmra.mrb[4].mxu1 %vm143_vm2, %v270_v40  ;;  %v1281_v40 = vld [vmem:[#allocation2 + $0x88] sm:$0xff]  }
 0x2bb   :  { %1191 = vmatprep.mubr.msk.f32.mxu1 %vm1351_vm0, %v1350_v0  ;;  %1250 = vmatpush3.bf16.msra.mxu1 %v1249_v14  ;;  %v1061_v14 = vld [vmem:[#allocation4 + $0x7] ss:$0 sm:$0xff] }
 0x2bc   :  { %1251 = vmatprep.subr.bf16.mxu1 %v1352_v13  ;;  %v1293_v13 = vld [vmem:[#allocation2 + $0xe8] sm:$0xff]  }
 0x2bf   :  { %1253 = vmatpush3.bf16.msra.mxu1 %v1252_v21 }
 0x2c0   :  { %1212 = vmatprep.subr.bf16.mxu1 %v1350_v0 }
 0x38d   :  { %v345_v43 = vpop.f32.mrb[4].mxu1 }
 0x38e   :  { %v346_v44 = vadd.f32 %v1038_v42, %v345_v43  ;;  %v1168_v45 = vpop.f32.mrb[5].mxu1  ;;  %v1283_v42 = vld [vmem:[#allocation2 + $0x98] sm:$0xff]   ;;  %v1284_v43 = vld [vmem:[#allocation2 + $0xa0] sm:$0xff]  }
 0x38f   :  { %v348_v46 = vpop.f32.mrb[6].mxu1 }
 0x390   :  { %v351_v47 = vmax.f32 %v346_v44, 0.0  ;;  %v1169_v48 = vpop.f32.mrb[7].mxu1  ;;  %v1285_v44 = vld [vmem:[#allocation2 + $0xa8] sm:$0xff]  }
 0x392   :  { %v352_v49 = vpack.c.bf16 %v351_v47, %v351_v47 }
 0x394   :  { %1175 = vmatmul.mubr.msk.bf16.vlgmr.msra.gmra.mrb[8].mxu0 %vm374_vm3, %v352_v49 }
 0x395   :  { %1179 = vmatpush3.msra.mxu0 %v418_v50  ;;  %1180 = vmatprep.mubr.msk.f32.mxu0 %vm1351_vm0, %v1350_v0 }
 0x396   :  { %1194 = vmatprep.subr.bf16.mxu0 %v1350_v0 }
 0x467   :  { %v412_v52 = vpop.f32.mrb[8].mxu0 }
 0x468   :  { %v413_v53 = vadd.f32 %v1044_v51, %v412_v52  ;;  %v1176_v54 = vpop.f32.mrb[9].mxu0 }
 0x469   :  { %v415_v55 = vpop.f32.mrb[10].mxu0 }
 0x46a   :  { %v1177_v56 = vpop.f32.mrb[11].mxu0  ;;  %1181 = vmatmul.mubr.msk.f32.vlgmr.msra.gmra.mrb[12].mxu0 %vm424_vm4, %v413_v53  ;;  %v423_v57 = vmul.f32 %v413_v53, %v413_v53 }
 0x46b   :  { %1196 = vmatprep.mubr.msk.bf16.mxu0 %vm1351_vm0, %v1350_v0  ;;  %1195 = vmatpush3.bf16.msra.mxu0 %v642_v23  ;;  %v1295_v23 = vld [vmem:[#allocation2 + $0xf8] sm:$0xff]  }
 0x46c   :  { %v425_v58 = vsel %vm424_vm4, %v423_v57, 0.0  ;;  %1200 = vmatprep.subr.bf16.mxu0 %v1350_v0 }
 0x46d   :  { %426 = vadd.xlane.f32.xlu0 %v425_v58 }
 0x4fa   :  { %v427_v60 = vpop.xlane.xlu0 %426 }
 0x4fb   :  { %v506_v62 = vadd.f32 %v1049_v59, %v427_v60 }
 0x53d   :  { %v497_v61 = vpop.f32.mrb[12].mxu0 }
 0x53e   :  { %v507_v63 = vmul.f32 2.0, %v497_v61  ;;  %v1182_v1 = vpop.f32.mrb[13].mxu0  ;;  %v1286_v61 = vld [vmem:[#allocation2 + $0xb0] sm:$0xff]  }
 0x53f   :  { %v1289_v1 = vld [vmem:[#allocation2 + $0xc8] sm:$0xff]  }
 0x540   :  { %v508_v2 = vsub.f32 %v506_v62, %v507_v63  ;;  %v1287_v62 = vld [vmem:[#allocation2 + $0xb8] sm:$0xff]   ;;  %v1288_v63 = vld [vmem:[#allocation2 + $0xc0] sm:$0xff]  }
 0x542   :  { %v509_v3 = vsel %vm374_vm3, %v508_v2, inf }
 0x543   :  { %510 = vmin.xlane.f32.xlu0 %v509_v3 }
 0x5d0   :  { %v511_v6 = vpop.xlane.xlu0 %510 }
 0x5d1   :  { %vm514_vm5 = vcmp.le.f32.partialorder %v508_v2, %v511_v6  ;;  %v1055_v2 = vld [vmem:[#allocation4 + $0x6] ss:$0 sm:$0xff] }
 0x5d2   :  { %v515_v7 = vsel %vm514_vm5, %v513_v5, 32 }
 0x5d3   :  { %v516_v8 = vsel %vm374_vm3, %v515_v7, 2147483647 }
 0x5d4   :  { %v518_v9 = vshra.s32 %v516_v8, 16  ;;  %v517_v15 = vand.u32 65535, %v516_v8 }
 0x5d6   :  { %v520_v10 = vcvt.s32.f32 %v518_v9  ;;  %v519_v17 = vcvt.s32.f32 %v517_v15 }
 0x5d8   :  { %521 = vmin.xlane.f32.xlu1 %v520_v10 }
 0x665   :  { %v522_v16 = vpop.xlane.xlu1 %521 }
 0x666   :  { %vm523_vm6 = vcmp.eq.f32.partialorder %v520_v10, %v522_v16  ;;  %v528_v24 = vcvt.f32.s32 %v522_v16  ;;  %v1290_v10 = vld [vmem:[#allocation2 + $0xd0] sm:$0xff]  }
 0x667   :  { %v524_v18 = vsel %vm523_vm6, %v519_v17, inf }
 0x668   :  { %525 = vmin.xlane.f32.xlu1 %v524_v18  ;;  %v529_v26 = vshll.u32 %v528_v24, 16  ;;  %v1067_v24 = vld [vmem:[#allocation4 + $0x8] ss:$0 sm:$0xff] }
 0x6f5   :  { %v526_v25 = vpop.xlane.xlu1 %525 }
 0x6f6   :  { %v527_v27 = vcvt.f32.s32 %v526_v25 }
 0x6f8   :  { %v530_v28 = vadd.s32 %v529_v26, %v527_v27 }
 0x6fa   :  { %vm531_vm8 = vcmp.eq.s32.totalorder %v513_v5, %v530_v28 }
 0x6fb   :  { %v1050_v29 = vsel %vm531_vm8, 1.0, %v1350_v0 }
 0x6fc   :  { %1192 = vmatmul.mubr.msk.f32.vlgmr.msra.gmra.mrb[8].mxu1 %vm374_vm3, %v1050_v29 }
 0x6fd   :  { %1220 = vmatprep.mubr.msk.bf16.mxu1 %vm1351_vm0, %v1350_v0  ;;  %1213 = vmatpush3.bf16.msra.mxu1 %v1284_v43 }
 0x6fe   :  { %1214 = vmatprep.subr.bf16.mxu1 %v1350_v0 }
 0x701   :  { %1215 = vmatpush3.bf16.msra.mxu1 %v1285_v44 }
 0x702   :  { %1216 = vmatprep.subr.bf16.mxu1 %v1350_v0 }
 0x705   :  { %1217 = vmatpush3.bf16.msra.mxu1 %v1286_v61 }
 0x706   :  { %1218 = vmatprep.subr.bf16.mxu1 %v1350_v0 }
 0x709   :  { %1219 = vmatpush3.bf16.msra.mxu1 %v1287_v62 }
 0x70a   :  { %1236 = vmatprep.subr.bf16.mxu1 %v1350_v0 }
 0x7cf   :  { %v603_v31 = vpop.f32.mrb[8].mxu1 }
 0x7d0   :  { %v615_v32 = vsub.f32 %v603_v31, %v413_v53  ;;  %v630_v33 = vpack.c.bf16 %v603_v31, %v603_v31  ;;  %v1193_v34 = vpop.f32.mrb[9].mxu1  ;;  %v1053_v53 = vld [vmem:[#allocation4 + $0x5] ss:$0 sm:$0xff] }
 0x7d2   :  { %v616_v36 = vmul.f32 %v615_v32, %v615_v32  ;;  %1197 = vmatmul.mubr.msk.bf16.vlgmr.msra.gmra.mrb[16].mxu0 %vm424_vm4, %v630_v33  ;;  %v1073_v32 = vld [vmem:[#allocation4 + $0x9] ss:$0 sm:$0xff] }
 0x7d3   :  { %1208 = vmatprep.mubr.msk.bf16.mxu0 %vm1351_vm0, %v1350_v0  ;;  %1201 = vmatpush3.bf16.msra.mxu0 %v1280_v39 }
 0x7d4   :  { %v617_v37 = vmul.f32 %v1052_v35, %v616_v36  ;;  %1202 = vmatprep.subr.bf16.mxu0 %v1350_v0 }
 0x7d6   :  { %v618_v38 = vsel %vm424_vm4, %v617_v37, 0.0 }
 0x7d7   :  { %619 = vadd.xlane.f32.xlu0 %v618_v38  ;;  %1203 = vmatpush3.bf16.msra.mxu0 %v1281_v40 }
 0x7d8   :  { %1204 = vmatprep.subr.bf16.mxu0 %v1350_v0 }
 0x7db   :  { %1205 = vmatpush3.bf16.msra.mxu0 %v1282_v41 }
 0x7dc   :  { %1206 = vmatprep.subr.bf16.mxu0 %v1350_v0 }
 0x7df   :  { %1207 = vmatpush3.bf16.msra.mxu0 %v1283_v42 }
 0x7e0   :  { %1224 = vmatprep.subr.bf16.mxu0 %v1350_v0 }
 0x864   :  { %v620_v45 = vpop.xlane.xlu0 %619 }
 0x865   :  { %v621_v46 = vrot.slane %v620_v45, 4 }
 0x867   :  { %v622_v47 = vadd.f32 %v621_v46, %v620_v45 }
 0x869   :  { %v623_v48 = vrot.slane %v622_v47, 2 }
 0x86b   :  { %v624_v49 = vadd.f32 %v623_v48, %v622_v47 }
 0x86d   :  { %v625_v50 = vrot.slane %v624_v49, 1 }
 0x86f   :  { %v626_v51 = vadd.f32 %v625_v50, %v624_v49 }
 0x871   :  { %1254 = vpush %v626_v51 }
 0x8a2   :  { %s1255_s0 = spop %1254 }
 0x8a3   :  { %v628_v52 = vstv %s1255_s0 }
 0x8a4   :  { %629 = vst [vmem:[%s1491_s4] sm:$0xff] %v628_v52 }
 0x8a5   :  { %v678_v54 = vpop.f32.mrb[16].mxu0 }
 0x8a6   :  { %v679_v55 = vadd.f32 %v1053_v53, %v678_v54  ;;  %v1198_v56 = vpop.f32.mrb[17].mxu0 }
 0x8a7   :  { %v681_v57 = vpop.f32.mrb[18].mxu0 }
 0x8a8   :  { %v684_v58 = vmax.f32 %v679_v55, 0.0  ;;  %v1199_v59 = vpop.f32.mrb[19].mxu0 }
 0x8aa   :  { %v685_v60 = vpack.c.bf16 %v684_v58, %v684_v58 }
 0x8ac   :  { %1209 = vmatmul.mubr.msk.bf16.vlgmr.msra.gmra.mrb[20].mxu0 %vm143_vm2, %v685_v60 }
 0x8ad   :  { %1232 = vmatprep.mubr.msk.bf16.mxu0 %vm1351_vm0, %v1350_v0  ;;  %1225 = vmatpush3.bf16.msra.mxu0 %v1288_v63 }
 0x8ae   :  { %1226 = vmatprep.subr.bf16.mxu0 %v1350_v0 }
 0x8b1   :  { %1227 = vmatpush3.bf16.msra.mxu0 %v1289_v1 }
 0x8b2   :  { %1228 = vmatprep.subr.bf16.mxu0 %v1350_v0 }
 0x8b5   :  { %1229 = vmatpush3.bf16.msra.mxu0 %v1290_v10 }
 0x8b6   :  { %1230 = vmatprep.subr.bf16.mxu0 %v1350_v0 }
 0x8b9   :  { %1231 = vmatpush3.bf16.msra.mxu0 %v1291_v11 }
 0x97f   :  { %v760_v3 = vpop.f32.mrb[20].mxu0 }
 0x980   :  { %v761_v4 = vadd.f32 %v1055_v2, %v760_v3  ;;  %v1210_v5 = vpop.f32.mrb[21].mxu0 }
 0x981   :  { %v763_v6 = vpop.f32.mrb[22].mxu0 }
 0x982   :  { %v766_v7 = vmax.f32 %v761_v4, 0.0  ;;  %v1211_v8 = vpop.f32.mrb[23].mxu0 }
 0x984   :  { %v767_v9 = vpack.c.bf16 %v766_v7, %v766_v7 }
 0x986   :  { %1221 = vmatmul.mubr.msk.bf16.vlgmr.msra.gmra.mrb[12].mxu1 %vm143_vm2, %v767_v9 }
 0x987   :  { %1244 = vmatprep.mubr.msk.bf16.mxu1 %vm1351_vm0, %v1350_v0  ;;  %1237 = vmatpush3.bf16.msra.mxu1 %v1292_v12 }
 0x988   :  { %1238 = vmatprep.subr.bf16.mxu1 %v1350_v0 }
 0x98b   :  { %1239 = vmatpush3.bf16.msra.mxu1 %v1293_v13 }
 0x98c   :  { %1240 = vmatprep.subr.bf16.mxu1 %v1350_v0 }
 0x98f   :  { %1241 = vmatpush3.bf16.msra.mxu1 %v1294_v22 }
 0x990   :  { %1242 = vmatprep.subr.bf16.mxu1 %v1350_v0 }
 0x993   :  { %1243 = vmatpush3.bf16.msra.mxu1 %v1295_v23 }
 0xa59   :  { %v842_v15 = vpop.f32.mrb[12].mxu1 }
 0xa5a   :  { %v843_v16 = vadd.f32 %v1061_v14, %v842_v15  ;;  %v1222_v17 = vpop.f32.mrb[13].mxu1 }
 0xa5b   :  { %v845_v18 = vpop.f32.mrb[14].mxu1 }
 0xa5c   :  { %v848_v19 = vmax.f32 %v843_v16, 0.0  ;;  %v1223_v20 = vpop.f32.mrb[15].mxu1 }
 0xa5e   :  { %v849_v21 = vpack.c.bf16 %v848_v19, %v848_v19 }
 0xa60   :  { %1233 = vmatmul.mubr.msk.bf16.vlgmr.msra.gmra.mrb[24].mxu0 %vm143_vm2, %v849_v21 }
 0xb33   :  { %v924_v25 = vpop.f32.mrb[24].mxu0 }
 0xb34   :  { %v925_v26 = vadd.f32 %v1067_v24, %v924_v25  ;;  %v1234_v27 = vpop.f32.mrb[25].mxu0 }
 0xb35   :  { %v927_v28 = vpop.f32.mrb[26].mxu0 }
 0xb36   :  { %v930_v29 = vmax.f32 %v925_v26, 0.0  ;;  %v1235_v30 = vpop.f32.mrb[27].mxu0 }
 0xb38   :  { %v931_v31 = vpack.c.bf16 %v930_v29, %v930_v29 }
 0xb3a   :  { %1245 = vmatmul.mubr.msk.bf16.vlgmr.msra.gmra.mrb[16].mxu1 %vm143_vm2, %v931_v31 }
 0xc0d   :  { %v1006_v33 = vpop.f32.mrb[16].mxu1 }
 0xc0e   :  { %v1007_v34 = vadd.f32 %v1073_v32, %v1006_v33  ;;  %v1246_v35 = vpop.f32.mrb[17].mxu1 }
 0xc0f   :  { %v1009_v36 = vpop.f32.mrb[18].mxu1 }
 0xc10   :  { %1012 = vst.msk [vmem:[%s1490_s3] sm:$0xff] %vm60_vm1, %v1007_v34  ;;  %v1247_v0 = vpop.f32.mrb[19].mxu1 }
 0xc11   :  { %1021 = vsyncpa [#allocation3], 1 }
 0xc12   :  { %1022 = vsyncpa [#allocation5], 1 }

</bundles_post_ra>
